<compile_context>
chip_gen: v5e
topology: v5e:2x2
jax: 0.10.0
libtpu: 0.0.40
codegen_flags: <defaults>
</compile_context>

<pallas_src>
import functools

import jax
import jax.numpy as jnp
import numpy as np
from jax.experimental import pallas as pl
from jax.experimental.pallas import tpu as pltpu

_EXPM_SQUARINGS = 6       # expm(A) = expm(A / 2**s) ** (2**s)
_EXPM_TAYLOR_ORDER = 8    # Taylor order for the scaled matrix (ample for f32)
_LANE = 128               # TPU lane width
_KB_MAX = 8               # max batch elements blocked into one apply grid step


def _vmem_capacity_bytes():
    try:
        cap = getattr(pltpu.get_tpu_info(), "vmem_capacity_bytes", None)
        if cap:
            return int(cap)
    except Exception:
        pass
    return 64 * 1024 * 1024   # conservative fallback (v7x physical VMEM)


_VMEM_CAP = _vmem_capacity_bytes()
# Scoped-VMEM limit we request: 64 MiB on v5e/v6e (128 MiB physical),
# 32 MiB on v7x (64 MiB physical).
_VMEM_LIMIT = int(min(_VMEM_CAP // 2, 64 * 1024 * 1024))
# Budget for the double-buffered state blocks of the apply kernel (headroom left
# for the small operator blocks + compiler scratch).
_BLOCK_BUDGET = int(min(_VMEM_CAP // 4, 24 * 1024 * 1024))


def _pow2_floor(x):
    x = max(1, int(x))
    return 1 << (x.bit_length() - 1)


def _largest_divisor(n, cap):
    cap = max(1, min(int(n), int(cap)))
    for d in range(cap, 0, -1):
        if n % d == 0:
            return d
    return 1


# ----------------------------------------------------------------------------
# Kernels
# ----------------------------------------------------------------------------
def _expm_kernel(a_ref, u_ref):
    """a_ref/u_ref: (KBe, 2D, 2D) real block embedding; U = expm(A) per batch."""
    a = a_ref[...]
    term = a
    v = a                                   # V-form Taylor: V = expm(A) - I
    for k in range(2, _EXPM_TAYLOR_ORDER + 1):
        term = jnp.einsum("kij,kjl->kil", term, a,
                          preferred_element_type=jnp.float32) * (1.0 / k)
        v = v + term
    for _ in range(_EXPM_SQUARINGS):        # (I + V)^2 = I + (2V + V @ V)
        v = v * 2.0 + jnp.einsum("kij,kjl->kil", v, v,
                                 preferred_element_type=jnp.float32)
    dd = u_ref.shape[-1]
    row = jax.lax.broadcasted_iota(jnp.int32, (dd, dd), 0)
    col = jax.lax.broadcasted_iota(jnp.int32, (dd, dd), 1)
    u_ref[...] = v + (row == col).astype(jnp.float32)[None]


def _apply_kernel(ur_ref, ui_ref, sr_ref, si_ref, or_ref, oi_ref):
    """Blocks: U* (KB, D, D); s*/o* (KB, D, RT).  out = U @ s (split complex)."""
    ur = ur_ref[...]
    ui = ui_ref[...]
    sr = sr_ref[...]
    si = si_ref[...]
    mm = functools.partial(jnp.einsum, "kij,kjr->kir",
                           preferred_element_type=jnp.float32)
    or_ref[...] = mm(ur, sr) - mm(ui, si)
    oi_ref[...] = mm(ui, sr) + mm(ur, si)


# ----------------------------------------------------------------------------
# pallas_call wrappers
# ----------------------------------------------------------------------------
def _expm_pallas(a_blk):
    B, DD, _ = a_blk.shape
    # ~10 live (KBe, DD, DD) f32 matrices inside the Taylor chain; keep < 8 MiB.
    kbe = _largest_divisor(B, min(_KB_MAX, max(1, (8 << 20) // (DD * DD * 4 * 10))))
    spec = pl.BlockSpec((kbe, DD, DD), lambda b: (b, 0, 0))
    return pl.pallas_call(
        _expm_kernel,
        out_shape=jax.ShapeDtypeStruct((B, DD, DD), jnp.float32),
        grid_spec=pltpu.PrefetchScalarGridSpec(
            num_scalar_prefetch=0, grid=(B // kbe,),
            in_specs=[spec], out_specs=spec),
        compiler_params=pltpu.CompilerParams(
            dimension_semantics=("parallel",),
            vmem_limit_bytes=_VMEM_LIMIT),
    )(a_blk)


def _apply_pallas(ur, ui, s_re, s_im, r_tile, kb):
    B, D, R = s_re.shape
    u_spec = pl.BlockSpec((kb, D, D), lambda b, r: (b, 0, 0))
    s_spec = pl.BlockSpec((kb, D, r_tile), lambda b, r: (b, 0, r))
    out_sd = jax.ShapeDtypeStruct((B, D, R), jnp.float32)
    return pl.pallas_call(
        _apply_kernel,
        out_shape=(out_sd, out_sd),
        grid_spec=pltpu.PrefetchScalarGridSpec(
            num_scalar_prefetch=0, grid=(B // kb, R // r_tile),
            in_specs=[u_spec, u_spec, s_spec, s_spec],
            out_specs=(s_spec, s_spec)),
        compiler_params=pltpu.CompilerParams(
            dimension_semantics=("parallel", "parallel"),
            vmem_limit_bytes=_VMEM_LIMIT),
    )(ur, ui, s_re, s_im)


def _choose_tiles(B, D, R):
    """VMEM-budget-driven R tile and batch-block size for the apply kernel."""
    # double-buffered state blocks: 2 bufs x 4 arrays x (kb * D * r_tile) f32
    per_lane = 32 * D
    r_cap = max(_LANE, _pow2_floor(_BLOCK_BUDGET // per_lane))
    r_tile = R if R <= r_cap else r_cap      # R = 2**k, so r_tile | R
    kb = 1
    if R // r_tile == 1:
        if B >= 2:
            kb_budget = max(1, _BLOCK_BUDGET // (per_lane * r_tile))
            # cap at B//2 so the grid keeps >= 2 steps (both v7x TCs busy)
            kb = _largest_divisor(B, min(B // 2, kb_budget, _KB_MAX))
        elif R >= 2 * _LANE:
            r_tile = R // 2                  # B == 1: split R across the 2 TCs
    return r_tile, kb


# ----------------------------------------------------------------------------
# Module
# ----------------------------------------------------------------------------
class HamiltonianEvolution:
    """JAX/Pallas port of pyqtorch.modules.hamevo.HamiltonianEvolution."""

    def __init__(self, qubits, n_qubits, n_steps=100):
        self.qubits = list(qubits)
        self.n_qubits = n_qubits
        self.n_steps = n_steps   # unused by the reference apply() (legacy arg)

    def __call__(self, H, t, state):
        return self.apply(H, t, state)

    def apply(self, H, t, state):
        H = jnp.asarray(H)
        t = jnp.atleast_1d(jnp.asarray(t))
        state = jnp.asarray(state)

        if H.ndim < 3:
            H = H[..., None]                  # torch: H.unsqueeze(2)
        D = H.shape[0]
        B = H.shape[2]                        # BATCH_DIM == 2
        m = len(self.qubits)
        n = self.n_qubits
        assert D == 2 ** m, "Hamiltonian size must match the target qubits"
        assert state.shape == (2,) * n + (B,), "state must be (2,)*n_qubits + (batch,)"

        # t_evo selection / broadcast (same rules as the torch reference)
        bt = t.shape[0]
        if bt >= B:
            t_evo = t[:B]
        elif bt == 1:
            t_evo = jnp.broadcast_to(t, (B,))
        else:
            t_evo = jnp.concatenate([t, jnp.zeros((B - bt,), dtype=t.dtype)])
        t_evo = t_evo.astype(jnp.complex64)

        # NOTE: torch's runtime is_diag() fast path computes the same exp(-i*t*H);
        # the general matrix-exp path below reproduces those semantics for all inputs.
        scale = jnp.float32(1.0 / (2 ** _EXPM_SQUARINGS))
        t_re = (jnp.real(t_evo).astype(jnp.float32) * scale)[:, None, None]
        t_im = (jnp.imag(t_evo).astype(jnp.float32) * scale)[:, None, None]

        Hc = H.astype(jnp.complex64)
        H_bdd = jnp.transpose(Hc, (2, 0, 1))          # (B, D, D)
        hr = jnp.real(H_bdd).astype(jnp.float32)
        hi = jnp.imag(H_bdd).astype(jnp.float32)

        # A = -i*t*H / 2**s:  Ar = t_im*Hr + t_re*Hi,  Ai = t_im*Hi - t_re*Hr
        ar = t_im * hr + t_re * hi
        ai = t_im * hi - t_re * hr
        # real block embedding [[Ar, -Ai], [Ai, Ar]] -> (B, 2D, 2D)  (tiny arrays)
        a_blk = jnp.concatenate(
            [jnp.concatenate([ar, -ai], axis=2),
             jnp.concatenate([ai, ar], axis=2)], axis=1)

        # Stage 1: U = expm(-i*t*H) per batch (hoisted, batch-blocked kernel).
        u_blk = _expm_pallas(a_blk)                   # (B, 2D, 2D) real block of U
        ur = u_blk[:, :D, :D]                         # Re(U)  (tiny XLA slices)
        ui = u_blk[:, D:, :D]                         # Im(U)

        # Stage 2 prep: state -> (B, D, R) with targets leading; keep re/im split
        # (no concat, no padding — block shapes use full dims below).
        targets = self.qubits
        rest = [q for q in range(n) if q not in targets]
        perm = [n] + targets + rest                   # single transpose
        R = 2 ** (n - m)
        sc = state.astype(jnp.complex64)
        s_bdr = jnp.transpose(sc, perm).reshape(B, D, R)
        s_re = jnp.real(s_bdr).astype(jnp.float32)
        s_im = jnp.imag(s_bdr).astype(jnp.float32)

        r_tile, kb = _choose_tiles(B, D, R)
        out_re, out_im = _apply_pallas(ur, ui, s_re, s_im, r_tile, kb)

        # Recombine + undo the permutation (single pass; XLA fuses complex+transpose).
        out_c = jax.lax.complex(out_re, out_im).reshape((B,) + (2,) * n)
        inv_perm = list(np.argsort(perm))
        return jnp.transpose(out_c, inv_perm)


# ----------------------------------------------------------------------------
# Pure-JAX reference (mirrors the torch einsum-based _apply_batch_gate), used
# only for a light sanity check in __main__.
# ----------------------------------------------------------------------------
_ABC = "abcdefghijklmnopqrstuvwxyzABCDEFGHIJKLMNOPQRSTUVWXYZ"


def _expm_ref(A):
    s, order = 6, 12
    A = A * (1.0 / (2 ** s))
    U = jnp.eye(A.shape[0], dtype=A.dtype) + A
    term = A
    for k in range(2, order + 1):
        term = (term @ A) / k
        U = U + term
    for _ in range(s):
        U = U @ U
    return U


def _reference(H, t, state, qubits, n_qubits):
    if H.ndim < 3:
        H = H[..., None]
    D, _, B = H.shape
    t = jnp.atleast_1d(t)
    bt = t.shape[0]
    if bt >= B:
        t_evo = t[:B]
    elif bt == 1:
        t_evo = jnp.broadcast_to(t, (B,))
    else:
        t_evo = jnp.concatenate([t, jnp.zeros((B - bt,), dtype=t.dtype)])
    t_evo = t_evo.astype(jnp.complex64)
    Hc = H.astype(jnp.complex64)
    U = jnp.stack([_expm_ref(-1j * t_evo[b] * Hc[..., b]) for b in range(B)],
                  axis=-1)                                    # (D, D, B)
    m = len(qubits)
    mat = U.reshape((2,) * (2 * m) + (B,))
    in_state = list(_ABC[: n_qubits + 1])
    mat_dims = list(_ABC[n_qubits + 1: n_qubits + 1 + 2 * m + 1])
    for j, q in enumerate(qubits):
        mat_dims[m + j] = in_state[q]
    mat_dims[-1] = in_state[-1]
    out_state = list(in_state)
    for j, q in enumerate(qubits):
        out_state[q] = mat_dims[j]
    eq = "".join(mat_dims) + "," + "".join(in_state) + "->" + "".join(out_state)
    return jnp.einsum(eq, mat, state.astype(jnp.complex64))


def _run_case(key, n_qubits, qubits, batch, t):
    D = 2 ** len(qubits)
    k1, k2, k3, k4 = jax.random.split(key, 4)

    # Deterministic Hermitian Hamiltonian batch, shape (D, D, batch), batch last.
    a_re = jax.random.normal(k1, (D, D, batch), dtype=jnp.float32)
    a_im = jax.random.normal(k2, (D, D, batch), dtype=jnp.float32)
    A = (a_re + 1j * a_im).astype(jnp.complex64)
    H = 0.5 * (A + jnp.conj(jnp.transpose(A, (1, 0, 2))))

    # Normalized random complex state of shape (2,)*n_qubits + (batch,).
    s_re = jax.random.normal(k3, (2,) * n_qubits + (batch,), dtype=jnp.float32)
    s_im = jax.random.normal(k4, (2,) * n_qubits + (batch,), dtype=jnp.float32)
    state = (s_re + 1j * s_im).astype(jnp.complex64)
    norm = jnp.sqrt(jnp.sum(jnp.abs(state) ** 2,
                            axis=tuple(range(n_qubits)), keepdims=True))
    state = state / norm

    ham_evo = HamiltonianEvolution(qubits, n_qubits)
    evolved = jax.block_until_ready(ham_evo(H, t, state))

    ref = _reference(H, t, state, qubits, n_qubits)
    assert evolved.shape == ref.shape == (2,) * n_qubits + (batch,)
    max_err = float(jnp.max(jnp.abs(evolved - ref)))
    assert max_err < 3e-2, f"max abs error too large: {max_err}"
    return max_err


if __name__ == "__main__":
    key = jax.random.PRNGKey(0)
    k_a, k_b, k_c = jax.random.split(key, 3)
    t = jnp.array([0.1, 0.2, 0.3], dtype=jnp.float32)

    # Small case: D=4, R=4 -> single tile, kb=1.
    _run_case(k_a, n_qubits=4, qubits=[0, 2], batch=2, t=t)
    # Larger spectator space: D=4, R=1024 -> lane-dense single R tile per batch.
    _run_case(k_b, n_qubits=12, qubits=[2, 5], batch=2, t=t)
    # Larger batch with tiny R -> exercises batch blocking (kb=4) and t broadcast.
    _run_case(k_c, n_qubits=6, qubits=[1, 3], batch=8,
              t=jnp.array([0.05], dtype=jnp.float32))

    print("KERNEL_OK")
</pallas_src>

<mosaic_0001>
module attributes {stable_mosaic.version = 11 : i64} {
  func.func @_expm_kernel(%arg0: i32, %arg1: memref<2x8x8xf32, #tpu.memory_space<vmem>>, %arg2: memref<2x8x8xf32, #tpu.memory_space<vmem>>) attributes {dimension_semantics = [#tpu.dimension_semantics<parallel>], iteration_bounds = array<i64: 1>, scalar_prefetch = 0 : i64, scratch_operands = 0 : i64, tpu.core_type = #tpu.core_type<tc>, window_params = [{transform_indices = @transform_0, window_bounds = array<i64: 2, 8, 8>}, {transform_indices = @transform_1, window_bounds = array<i64: 2, 8, 8>}]} {
    %c0 = arith.constant 0 : index
    %c0_0 = arith.constant 0 : index
    %c0_1 = arith.constant 0 : index
    %0 = vector.load %arg1[%c0, %c0_0, %c0_1] : memref<2x8x8xf32, #tpu.memory_space<vmem>>, vector<2x8x8xf32>
    "tpu.trace_start"() <{level = 10 : i32, message = "kij,kjl->kil"}> : () -> ()
    %cst = arith.constant dense<0.000000e+00> : vector<2x8x8xf32>
    %1 = tpu.matmul %0, %0, %cst {dimension_numbers = #tpu.dot_dimension_numbers<[2], [1], [1], [2], [0, 0, 0, 1, 1, 2], [0], [0]>} : vector<2x8x8xf32>, vector<2x8x8xf32>, vector<2x8x8xf32> -> vector<2x8x8xf32>
    "tpu.trace_stop"() : () -> ()
    %cst_2 = arith.constant 5.000000e-01 : f32
    %2 = vector.broadcast %cst_2 : f32 to vector<2x8x8xf32>
    %3 = arith.mulf %1, %2 : vector<2x8x8xf32>
    %4 = arith.addf %0, %3 : vector<2x8x8xf32>
    "tpu.trace_start"() <{level = 10 : i32, message = "kij,kjl->kil"}> : () -> ()
    %cst_3 = arith.constant dense<0.000000e+00> : vector<2x8x8xf32>
    %5 = tpu.matmul %3, %0, %cst_3 {dimension_numbers = #tpu.dot_dimension_numbers<[2], [1], [1], [2], [0, 0, 0, 1, 1, 2], [0], [0]>} : vector<2x8x8xf32>, vector<2x8x8xf32>, vector<2x8x8xf32> -> vector<2x8x8xf32>
    "tpu.trace_stop"() : () -> ()
    %cst_4 = arith.constant 0.333333343 : f32
    %6 = vector.broadcast %cst_4 : f32 to vector<2x8x8xf32>
    %7 = arith.mulf %5, %6 : vector<2x8x8xf32>
    %8 = arith.addf %4, %7 : vector<2x8x8xf32>
    "tpu.trace_start"() <{level = 10 : i32, message = "kij,kjl->kil"}> : () -> ()
    %cst_5 = arith.constant dense<0.000000e+00> : vector<2x8x8xf32>
    %9 = tpu.matmul %7, %0, %cst_5 {dimension_numbers = #tpu.dot_dimension_numbers<[2], [1], [1], [2], [0, 0, 0, 1, 1, 2], [0], [0]>} : vector<2x8x8xf32>, vector<2x8x8xf32>, vector<2x8x8xf32> -> vector<2x8x8xf32>
    "tpu.trace_stop"() : () -> ()
    %cst_6 = arith.constant 2.500000e-01 : f32
    %10 = vector.broadcast %cst_6 : f32 to vector<2x8x8xf32>
    %11 = arith.mulf %9, %10 : vector<2x8x8xf32>
    %12 = arith.addf %8, %11 : vector<2x8x8xf32>
    "tpu.trace_start"() <{level = 10 : i32, message = "kij,kjl->kil"}> : () -> ()
    %cst_7 = arith.constant dense<0.000000e+00> : vector<2x8x8xf32>
    %13 = tpu.matmul %11, %0, %cst_7 {dimension_numbers = #tpu.dot_dimension_numbers<[2], [1], [1], [2], [0, 0, 0, 1, 1, 2], [0], [0]>} : vector<2x8x8xf32>, vector<2x8x8xf32>, vector<2x8x8xf32> -> vector<2x8x8xf32>
    "tpu.trace_stop"() : () -> ()
    %cst_8 = arith.constant 2.000000e-01 : f32
    %14 = vector.broadcast %cst_8 : f32 to vector<2x8x8xf32>
    %15 = arith.mulf %13, %14 : vector<2x8x8xf32>
    %16 = arith.addf %12, %15 : vector<2x8x8xf32>
    "tpu.trace_start"() <{level = 10 : i32, message = "kij,kjl->kil"}> : () -> ()
    %cst_9 = arith.constant dense<0.000000e+00> : vector<2x8x8xf32>
    %17 = tpu.matmul %15, %0, %cst_9 {dimension_numbers = #tpu.dot_dimension_numbers<[2], [1], [1], [2], [0, 0, 0, 1, 1, 2], [0], [0]>} : vector<2x8x8xf32>, vector<2x8x8xf32>, vector<2x8x8xf32> -> vector<2x8x8xf32>
    "tpu.trace_stop"() : () -> ()
    %cst_10 = arith.constant 0.166666672 : f32
    %18 = vector.broadcast %cst_10 : f32 to vector<2x8x8xf32>
    %19 = arith.mulf %17, %18 : vector<2x8x8xf32>
    %20 = arith.addf %16, %19 : vector<2x8x8xf32>
    "tpu.trace_start"() <{level = 10 : i32, message = "kij,kjl->kil"}> : () -> ()
    %cst_11 = arith.constant dense<0.000000e+00> : vector<2x8x8xf32>
    %21 = tpu.matmul %19, %0, %cst_11 {dimension_numbers = #tpu.dot_dimension_numbers<[2], [1], [1], [2], [0, 0, 0, 1, 1, 2], [0], [0]>} : vector<2x8x8xf32>, vector<2x8x8xf32>, vector<2x8x8xf32> -> vector<2x8x8xf32>
    "tpu.trace_stop"() : () -> ()
    %cst_12 = arith.constant 0.142857149 : f32
    %22 = vector.broadcast %cst_12 : f32 to vector<2x8x8xf32>
    %23 = arith.mulf %21, %22 : vector<2x8x8xf32>
    %24 = arith.addf %20, %23 : vector<2x8x8xf32>
    "tpu.trace_start"() <{level = 10 : i32, message = "kij,kjl->kil"}> : () -> ()
    %cst_13 = arith.constant dense<0.000000e+00> : vector<2x8x8xf32>
    %25 = tpu.matmul %23, %0, %cst_13 {dimension_numbers = #tpu.dot_dimension_numbers<[2], [1], [1], [2], [0, 0, 0, 1, 1, 2], [0], [0]>} : vector<2x8x8xf32>, vector<2x8x8xf32>, vector<2x8x8xf32> -> vector<2x8x8xf32>
    "tpu.trace_stop"() : () -> ()
    %cst_14 = arith.constant 1.250000e-01 : f32
    %26 = vector.broadcast %cst_14 : f32 to vector<2x8x8xf32>
    %27 = arith.mulf %25, %26 : vector<2x8x8xf32>
    %28 = arith.addf %24, %27 : vector<2x8x8xf32>
    %cst_15 = arith.constant 2.000000e+00 : f32
    %29 = vector.broadcast %cst_15 : f32 to vector<2x8x8xf32>
    %30 = arith.mulf %28, %29 : vector<2x8x8xf32>
    "tpu.trace_start"() <{level = 10 : i32, message = "kij,kjl->kil"}> : () -> ()
    %cst_16 = arith.constant dense<0.000000e+00> : vector<2x8x8xf32>
    %31 = tpu.matmul %28, %28, %cst_16 {dimension_numbers = #tpu.dot_dimension_numbers<[2], [1], [1], [2], [0, 0, 0, 1, 1, 2], [0], [0]>} : vector<2x8x8xf32>, vector<2x8x8xf32>, vector<2x8x8xf32> -> vector<2x8x8xf32>
    "tpu.trace_stop"() : () -> ()
    %32 = arith.addf %30, %31 : vector<2x8x8xf32>
    %cst_17 = arith.constant 2.000000e+00 : f32
    %33 = vector.broadcast %cst_17 : f32 to vector<2x8x8xf32>
    %34 = arith.mulf %32, %33 : vector<2x8x8xf32>
    "tpu.trace_start"() <{level = 10 : i32, message = "kij,kjl->kil"}> : () -> ()
    %cst_18 = arith.constant dense<0.000000e+00> : vector<2x8x8xf32>
    %35 = tpu.matmul %32, %32, %cst_18 {dimension_numbers = #tpu.dot_dimension_numbers<[2], [1], [1], [2], [0, 0, 0, 1, 1, 2], [0], [0]>} : vector<2x8x8xf32>, vector<2x8x8xf32>, vector<2x8x8xf32> -> vector<2x8x8xf32>
    "tpu.trace_stop"() : () -> ()
    %36 = arith.addf %34, %35 : vector<2x8x8xf32>
    %cst_19 = arith.constant 2.000000e+00 : f32
    %37 = vector.broadcast %cst_19 : f32 to vector<2x8x8xf32>
    %38 = arith.mulf %36, %37 : vector<2x8x8xf32>
    "tpu.trace_start"() <{level = 10 : i32, message = "kij,kjl->kil"}> : () -> ()
    %cst_20 = arith.constant dense<0.000000e+00> : vector<2x8x8xf32>
    %39 = tpu.matmul %36, %36, %cst_20 {dimension_numbers = #tpu.dot_dimension_numbers<[2], [1], [1], [2], [0, 0, 0, 1, 1, 2], [0], [0]>} : vector<2x8x8xf32>, vector<2x8x8xf32>, vector<2x8x8xf32> -> vector<2x8x8xf32>
    "tpu.trace_stop"() : () -> ()
    %40 = arith.addf %38, %39 : vector<2x8x8xf32>
    %cst_21 = arith.constant 2.000000e+00 : f32
    %41 = vector.broadcast %cst_21 : f32 to vector<2x8x8xf32>
    %42 = arith.mulf %40, %41 : vector<2x8x8xf32>
    "tpu.trace_start"() <{level = 10 : i32, message = "kij,kjl->kil"}> : () -> ()
    %cst_22 = arith.constant dense<0.000000e+00> : vector<2x8x8xf32>
    %43 = tpu.matmul %40, %40, %cst_22 {dimension_numbers = #tpu.dot_dimension_numbers<[2], [1], [1], [2], [0, 0, 0, 1, 1, 2], [0], [0]>} : vector<2x8x8xf32>, vector<2x8x8xf32>, vector<2x8x8xf32> -> vector<2x8x8xf32>
    "tpu.trace_stop"() : () -> ()
    %44 = arith.addf %42, %43 : vector<2x8x8xf32>
    %cst_23 = arith.constant 2.000000e+00 : f32
    %45 = vector.broadcast %cst_23 : f32 to vector<2x8x8xf32>
    %46 = arith.mulf %44, %45 : vector<2x8x8xf32>
    "tpu.trace_start"() <{level = 10 : i32, message = "kij,kjl->kil"}> : () -> ()
    %cst_24 = arith.constant dense<0.000000e+00> : vector<2x8x8xf32>
    %47 = tpu.matmul %44, %44, %cst_24 {dimension_numbers = #tpu.dot_dimension_numbers<[2], [1], [1], [2], [0, 0, 0, 1, 1, 2], [0], [0]>} : vector<2x8x8xf32>, vector<2x8x8xf32>, vector<2x8x8xf32> -> vector<2x8x8xf32>
    "tpu.trace_stop"() : () -> ()
    %48 = arith.addf %46, %47 : vector<2x8x8xf32>
    %cst_25 = arith.constant 2.000000e+00 : f32
    %49 = vector.broadcast %cst_25 : f32 to vector<2x8x8xf32>
    %50 = arith.mulf %48, %49 : vector<2x8x8xf32>
    "tpu.trace_start"() <{level = 10 : i32, message = "kij,kjl->kil"}> : () -> ()
    %cst_26 = arith.constant dense<0.000000e+00> : vector<2x8x8xf32>
    %51 = tpu.matmul %48, %48, %cst_26 {dimension_numbers = #tpu.dot_dimension_numbers<[2], [1], [1], [2], [0, 0, 0, 1, 1, 2], [0], [0]>} : vector<2x8x8xf32>, vector<2x8x8xf32>, vector<2x8x8xf32> -> vector<2x8x8xf32>
    "tpu.trace_stop"() : () -> ()
    %52 = arith.addf %50, %51 : vector<2x8x8xf32>
    %53 = tpu.iota {dimensions = array<i32: 0>} : vector<8x8xi32>
    %54 = tpu.iota {dimensions = array<i32: 1>} : vector<8x8xi32>
    %55 = arith.cmpi eq, %53, %54 : vector<8x8xi32>
    %56 = arith.extui %55 : vector<8x8xi1> to vector<8x8xi32>
    %57 = arith.sitofp %56 : vector<8x8xi32> to vector<8x8xf32>
    %58 = vector.shape_cast %57 : vector<8x8xf32> to vector<1x8x8xf32>
    %59 = vector.broadcast %58 : vector<1x8x8xf32> to vector<2x8x8xf32>
    %60 = arith.addf %52, %59 : vector<2x8x8xf32>
    %c0_27 = arith.constant 0 : index
    %c0_28 = arith.constant 0 : index
    %c0_29 = arith.constant 0 : index
    %61 = vector.load %arg2[%c0_27, %c0_28, %c0_29] : memref<2x8x8xf32, #tpu.memory_space<vmem>>, vector<2x8x8xf32>
    tpu.vector_store %arg2[%c0_27, %c0_28, %c0_29], %60 {strides = array<i32>} : memref<2x8x8xf32, #tpu.memory_space<vmem>>, vector<2x8x8xf32>,
    return
  }
  func.func @transform_0(%arg0: i32) -> (i32, i32, i32) {
    %c0_i32 = arith.constant 0 : i32
    %c0_i32_0 = arith.constant 0 : i32
    %c0_i32_1 = arith.constant 0 : i32
    return %arg0, %c0_i32, %c0_i32_0 : i32, i32, i32
  }
  func.func @transform_1(%arg0: i32) -> (i32, i32, i32) {
    %c0_i32 = arith.constant 0 : i32
    %c0_i32_0 = arith.constant 0 : i32
    %c0_i32_1 = arith.constant 0 : i32
    return %arg0, %c0_i32, %c0_i32_0 : i32, i32, i32
  }
}

</mosaic_0001>

<bundles_post_ra>
// kernel: tpu_custom_call.1
= control target key start
LH: loop header
LB: loop body
LE: loop exit
PB: predicated region body
PF: predicated region fallthrough
CT: control target
= control target key end

     0   :  { %6 = vsyncpa [#allocation3], 0  ;;  %s847_s0 = inlined_call_operand.hbm [shape: f32[2,8,8], index: 0, kind: input, shape index: {}]   ;;  %s848_s1 = inlined_call_operand.hbm [shape: f32[2,8,8], index: 1, kind: output, shape index: {}]  }
   0x1   :  { %7 = vsyncpa [#allocation4], 0  ;;  %s12_s8 = sshll.u32 %s847_s0, 4  ;;  %s792_s9 = smov [#allocation2]   ;;  %s13_s8 = int_to_ptr.hbm [resolvable:$true] %s12_s8 }
   0x2   :  { %s14_s10 = sshll.u32 %s792_s9, 4  ;;  %s793_s11 = smov 128   ;;  %s15_s10 = int_to_ptr.vmem [resolvable:$true] %s14_s10 }
   0x3   :  { %s794_s12 = smov 8  }
   0x4   :  { %20 = dma.hbm_to_vmem [thread:$0]  %s13_s8, 256, %s15_s10, [#allocation3], %s793_s11, %s793_s11, %s794_s12  }
   0x5   :  { %788 = dma.done.wait [#allocation3], 256  }
   0x6   :  { %789 = vsyncadd [#allocation3], 4294967040  ;;  %vm27_vm0 = vcmask 64512   ;;  %v25_v0 = vld [vmem:[#allocation2] sm:$0xff]  ;;  %v26_v1 = vld [vmem:[#allocation2 + $0x8] sm:$0xff]  ;;  %s796_s0 = smov [#allocation5]  }
   0x7   :  { %46 = vmatpush.msra.mxu0 %v25_v0  ;;  %69 = vmatpush.msra.mxu1 %v26_v1  ;;  %s693_s13 = sshll.u32 %s796_s0, 4  ;;  %s695_s16 = sshll.u32 %s848_s1, 4  ;;  %s694_s13 = int_to_ptr.vmem [resolvable:$true] %s693_s13  ;;  %s696_s16 = int_to_ptr.hbm [resolvable:$true] %s695_s16 }
   0x8   :  { %708 = vmatmul.msk.f32.vlgmr.msra.gmra.mxu0 %vm27_vm0, %v25_v0  ;;  %709 = vmatmul.msk.f32.vlgmr.msra.gmra.mxu1 %vm27_vm0, %v26_v1 }
   0x9   :  { %96 = vmatpush.msra.mxu2 %v25_v0  ;;  %119 = vmatpush.msra.mxu3 %v26_v1 }
   0xa   :  { %146 = vmatpush.msrb.mxu0 %v25_v0  ;;  %169 = vmatpush.msrb.mxu1 %v26_v1 }
   0xb   :  { %196 = vmatpush.msrb.mxu2 %v25_v0  ;;  %219 = vmatpush.msrb.mxu3 %v26_v1 }
   0xc   :  { %246 = vmatpush.msra.mxu0 %v25_v0  ;;  %269 = vmatpush.msra.mxu1 %v26_v1 }
  0x85   :  { %v48_v2 = vpop.f32.mrf.mxu0  ;;  %v71_v3 = vpop.f32.mrf.mxu1 }
  0x86   :  { %v74_v4 = vmul.f32 0.5, %v48_v2  ;;  %v75_v5 = vmul.f32 0.5, %v71_v3 }
  0x88   :  { %710 = vmatmul.msk.f32.vlgmr.msra.gmra.mxu2 %vm27_vm0, %v74_v4  ;;  %711 = vmatmul.msk.f32.vlgmr.msra.gmra.mxu3 %vm27_vm0, %v75_v5  ;;  %v76_v8 = vadd.f32 %v74_v4, %v25_v0  ;;  %v77_v9 = vadd.f32 %v75_v5, %v26_v1 }
  0x89   :  { %296 = vmatpush.msra.mxu2 %v25_v0  ;;  %319 = vmatpush.msra.mxu3 %v26_v1 }
 0x10b   :  { %v98_v6 = vpop.f32.mrf.mxu2  ;;  %v121_v7 = vpop.f32.mrf.mxu3 }
 0x10c   :  { %v124_v10 = vmul.f32 0.33333334, %v98_v6  ;;  %v125_v11 = vmul.f32 0.33333334, %v121_v7 }
 0x10e   :  { %v126_v12 = vadd.f32 %v124_v10, %v76_v8  ;;  %v127_v13 = vadd.f32 %v125_v11, %v77_v9  ;;  %712 = vmatmul.msk.f32.vlgmr.msrb.gmra.mxu0 %vm27_vm0, %v124_v10  ;;  %713 = vmatmul.msk.f32.vlgmr.msrb.gmra.mxu1 %vm27_vm0, %v125_v11  ;;  %v678_v10 = vlaneseq }
 0x10f   :  { %346 = vmatpush.msrb.mxu0 %v25_v0  ;;  %369 = vmatpush.msrb.mxu1 %v26_v1 }
 0x110   :  { %v679_v11 = vshrl.u32 %v678_v10, 7 }
 0x18b   :  { %v148_v14 = vpop.f32.mrf.mxu0  ;;  %v171_v15 = vpop.f32.mrf.mxu1 }
 0x18c   :  { %v174_v16 = vmul.f32 0.25, %v148_v14  ;;  %v175_v17 = vmul.f32 0.25, %v171_v15 }
 0x18e   :  { %v176_v18 = vadd.f32 %v174_v16, %v126_v12  ;;  %v177_v19 = vadd.f32 %v175_v17, %v127_v13  ;;  %714 = vmatmul.msk.f32.vlgmr.msrb.gmra.mxu2 %vm27_vm0, %v174_v16  ;;  %715 = vmatmul.msk.f32.vlgmr.msrb.gmra.mxu3 %vm27_vm0, %v175_v17  ;;  %v681_v12 = vand.u32 127, %v678_v10  ;;  %v795_v16 = vmov 0.0  }
 0x190   :  { %vm682_vm1 = vcmp.eq.s32.totalorder %v679_v11, %v681_v12 }
 0x191   :  { %v734_v17 = vsel %vm682_vm1, 1.0, %v795_v16 }
 0x211   :  { %v198_v20 = vpop.f32.mrf.mxu2  ;;  %v221_v21 = vpop.f32.mrf.mxu3 }
 0x212   :  { %v224_v22 = vmul.f32 0.2, %v198_v20  ;;  %v225_v23 = vmul.f32 0.2, %v221_v21 }
 0x214   :  { %v226_v24 = vadd.f32 %v224_v22, %v176_v18  ;;  %v227_v25 = vadd.f32 %v225_v23, %v177_v19  ;;  %716 = vmatmul.msk.f32.vlgmr.msra.gmra.mxu0 %vm27_vm0, %v224_v22  ;;  %717 = vmatmul.msk.f32.vlgmr.msra.gmra.mxu1 %vm27_vm0, %v225_v23 }
 0x291   :  { %v248_v26 = vpop.f32.mrf.mxu0  ;;  %v271_v27 = vpop.f32.mrf.mxu1 }
 0x292   :  { %v274_v28 = vmul.f32 0.16666667, %v248_v26  ;;  %v275_v29 = vmul.f32 0.16666667, %v271_v27 }
 0x294   :  { %v276_v30 = vadd.f32 %v274_v28, %v226_v24  ;;  %v277_v31 = vadd.f32 %v275_v29, %v227_v25  ;;  %718 = vmatmul.msk.f32.vlgmr.msra.gmra.mxu2 %vm27_vm0, %v274_v28  ;;  %719 = vmatmul.msk.f32.vlgmr.msra.gmra.mxu3 %vm27_vm0, %v275_v29 }
 0x317   :  { %v298_v32 = vpop.f32.mrf.mxu2  ;;  %v321_v33 = vpop.f32.mrf.mxu3 }
 0x318   :  { %v324_v34 = vmul.f32 0.14285715, %v298_v32  ;;  %v325_v35 = vmul.f32 0.14285715, %v321_v33 }
 0x31a   :  { %v326_v36 = vadd.f32 %v324_v34, %v276_v30  ;;  %v327_v37 = vadd.f32 %v325_v35, %v277_v31  ;;  %720 = vmatmul.msk.f32.vlgmr.msrb.gmra.mxu0 %vm27_vm0, %v324_v34  ;;  %721 = vmatmul.msk.f32.vlgmr.msrb.gmra.mxu1 %vm27_vm0, %v325_v35 }
 0x397   :  { %v348_v38 = vpop.f32.mrf.mxu0  ;;  %v371_v39 = vpop.f32.mrf.mxu1 }
 0x398   :  { %v374_v40 = vmul.f32 0.125, %v348_v38  ;;  %v375_v41 = vmul.f32 0.125, %v371_v39 }
 0x39a   :  { %v376_v42 = vadd.f32 %v374_v40, %v326_v36  ;;  %v377_v43 = vadd.f32 %v375_v41, %v327_v37 }
 0x39c   :  { %398 = vmatpush.msrb.mxu2 %v376_v42  ;;  %421 = vmatpush.msrb.mxu3 %v377_v43  ;;  %v378_v44 = vmul.f32 2.0, %v376_v42  ;;  %v379_v45 = vmul.f32 2.0, %v377_v43 }
 0x39d   :  { %722 = vmatmul.msk.f32.vlgmr.msrb.gmra.mxu2 %vm27_vm0, %v376_v42  ;;  %723 = vmatmul.msk.f32.vlgmr.msrb.gmra.mxu3 %vm27_vm0, %v377_v43 }
 0x420   :  { %v400_v46 = vpop.f32.mrf.mxu2  ;;  %v423_v47 = vpop.f32.mrf.mxu3 }
 0x421   :  { %v426_v48 = vadd.f32 %v400_v46, %v378_v44  ;;  %v427_v49 = vadd.f32 %v423_v47, %v379_v45 }
 0x423   :  { %448 = vmatpush.msra.mxu0 %v426_v48  ;;  %471 = vmatpush.msra.mxu1 %v427_v49  ;;  %v428_v50 = vmul.f32 2.0, %v426_v48  ;;  %v429_v51 = vmul.f32 2.0, %v427_v49 }
 0x424   :  { %724 = vmatmul.msk.f32.vlgmr.msra.gmra.mxu0 %vm27_vm0, %v426_v48  ;;  %725 = vmatmul.msk.f32.vlgmr.msra.gmra.mxu1 %vm27_vm0, %v427_v49 }
 0x4a1   :  { %v450_v52 = vpop.f32.mrf.mxu0  ;;  %v473_v53 = vpop.f32.mrf.mxu1 }
 0x4a2   :  { %v476_v54 = vadd.f32 %v450_v52, %v428_v50  ;;  %v477_v55 = vadd.f32 %v473_v53, %v429_v51 }
 0x4a4   :  { %498 = vmatpush.msra.mxu2 %v476_v54  ;;  %521 = vmatpush.msra.mxu3 %v477_v55  ;;  %v478_v56 = vmul.f32 2.0, %v476_v54  ;;  %v479_v57 = vmul.f32 2.0, %v477_v55 }
 0x4a5   :  { %726 = vmatmul.msk.f32.vlgmr.msra.gmra.mxu2 %vm27_vm0, %v476_v54  ;;  %727 = vmatmul.msk.f32.vlgmr.msra.gmra.mxu3 %vm27_vm0, %v477_v55 }
 0x528   :  { %v500_v58 = vpop.f32.mrf.mxu2  ;;  %v523_v59 = vpop.f32.mrf.mxu3 }
 0x529   :  { %v526_v60 = vadd.f32 %v500_v58, %v478_v56  ;;  %v527_v61 = vadd.f32 %v523_v59, %v479_v57 }
 0x52b   :  { %548 = vmatpush.msrb.mxu0 %v526_v60  ;;  %571 = vmatpush.msrb.mxu1 %v527_v61  ;;  %v528_v62 = vmul.f32 2.0, %v526_v60  ;;  %v529_v63 = vmul.f32 2.0, %v527_v61 }
 0x52c   :  { %728 = vmatmul.msk.f32.vlgmr.msrb.gmra.mxu0 %vm27_vm0, %v526_v60  ;;  %729 = vmatmul.msk.f32.vlgmr.msrb.gmra.mxu1 %vm27_vm0, %v527_v61 }
 0x5a9   :  { %v550_v0 = vpop.f32.mrf.mxu0  ;;  %v573_v1 = vpop.f32.mrf.mxu1 }
 0x5aa   :  { %v576_v2 = vadd.f32 %v550_v0, %v528_v62  ;;  %v577_v3 = vadd.f32 %v573_v1, %v529_v63 }
 0x5ac   :  { %598 = vmatpush.msrb.mxu2 %v576_v2  ;;  %621 = vmatpush.msrb.mxu3 %v577_v3  ;;  %v578_v4 = vmul.f32 2.0, %v576_v2  ;;  %v579_v5 = vmul.f32 2.0, %v577_v3 }
 0x5ad   :  { %730 = vmatmul.msk.f32.vlgmr.msrb.gmra.mxu2 %vm27_vm0, %v576_v2  ;;  %731 = vmatmul.msk.f32.vlgmr.msrb.gmra.mxu3 %vm27_vm0, %v577_v3 }
 0x630   :  { %v600_v6 = vpop.f32.mrf.mxu2  ;;  %v623_v7 = vpop.f32.mrf.mxu3 }
 0x631   :  { %v626_v8 = vadd.f32 %v600_v6, %v578_v4  ;;  %v627_v9 = vadd.f32 %v623_v7, %v579_v5 }
 0x633   :  { %648 = vmatpush.msra.mxu0 %v626_v8  ;;  %671 = vmatpush.msra.mxu1 %v627_v9  ;;  %v628_v13 = vmul.f32 2.0, %v626_v8  ;;  %v629_v14 = vmul.f32 2.0, %v627_v9 }
 0x634   :  { %732 = vmatmul.msk.f32.vlgmr.msra.gmra.mxu0 %vm27_vm0, %v626_v8  ;;  %733 = vmatmul.msk.f32.vlgmr.msra.gmra.mxu1 %vm27_vm0, %v627_v9 }
 0x6b1   :  { %v650_v15 = vpop.f32.mrf.mxu0  ;;  %v673_v18 = vpop.f32.mrf.mxu1 }
 0x6b2   :  { %v676_v19 = vadd.f32 %v650_v15, %v628_v13  ;;  %v677_v20 = vadd.f32 %v673_v18, %v629_v14 }
 0x6b4   :  { %v685_v21 = vadd.f32 %v734_v17, %v676_v19  ;;  %v686_v22 = vadd.f32 %v734_v17, %v677_v20 }
 0x6b6   :  { %687 = vst.msk [vmem:[#allocation5] sm:$0xff] %vm27_vm0, %v685_v21 }
 0x6b7   :  { %688 = vst.msk [vmem:[#allocation5 + $0x8] sm:$0xff] %vm27_vm0, %v686_v22 }
 0x6b8   :  { %701 = dma.vmem_to_hbm [thread:$0]  %s694_s13, 256, %s696_s16, [#allocation4], %s793_s11, %s793_s11, %s794_s12  }
 0x6b9   :  { %790 = dma.done.wait [#allocation4], 256  }
 0x6ba   :  { %791 = vsyncadd [#allocation4], 4294967040 }
 0x6bb   :  { %706 = vsyncpa [#allocation3], 1 }
 0x6bc   :  { %707 = vsyncpa [#allocation4], 1 }

</bundles_post_ra>
